<compile_context>
chip_gen: v6e
topology: v6e:2x2x1
jax: 0.10.0
libtpu: 0.0.40
codegen_flags: <defaults>
</compile_context>

<pallas_src>
import jax
import jax.numpy as jnp
from jax.experimental import pallas as pl
from jax.experimental.pallas import tpu as pltpu


def policy_net_kernel(x_ref, w1_ref, b1_ref, w2_ref, b2_ref, o_ref):
    # ---- Layer 1 on the VPU (K = state_dim is tiny) --------------------------
    x = x_ref[...]                       # (Bp, K)  f32
    w1 = w1_ref[...]                     # (K, H)   f32
    h = b1_ref[...]                      # (1, H)   f32, broadcasts on first add
    for k in range(x.shape[1]):          # static unroll: K vmul + vadd
        h = h + x[:, k:k + 1] * w1[k:k + 1, :]
    h = jnp.tanh(h)                      # f32 tanh (EUP); bf16 tanh unsupported on v5e

    # ---- Layer 2 on the MXU, f32 accumulation --------------------------------
    # w2_ref may be bf16 (v6e/v7x weight path); cast h to match, accumulate f32.
    logits = jnp.dot(h.astype(w2_ref.dtype), w2_ref[...],
                     preferred_element_type=jnp.float32)
    # Bias add once per output tile (kept out of any future K-reduction loop).
    o_ref[...] = (logits + b2_ref[...]).astype(o_ref.dtype)


def policy_net_forward(state, w1, b1, w2, b2, *, weight_dtype=jnp.float32):
    """PyTorch-layout params:
      state: (B, state_dim) f32
      w1: (hidden, state_dim), b1: (hidden,)     -- state_fc
      w2: (vocab, hidden),     b2: (vocab,)      -- head
    Returns logits (B, vocab) f32.
    """
    B, K = state.shape
    H = w1.shape[0]
    V = w2.shape[0]

    # Pre-transpose to x @ W layout; biases as (1, out).
    w1_t = w1.T.astype(jnp.float32)              # (K, H)
    b1_r = b1.reshape(1, H).astype(jnp.float32)  # (1, H)
    w2_t = w2.T.astype(weight_dtype)             # (H, V)
    b2_r = b2.reshape(1, V).astype(jnp.float32)  # (1, V)

    # Pad batch to a sublane multiple (8) and vocab to a lane-dense multiple
    # of 128 so output stores are unmasked full-vreg stores.
    Bp = int(pl.cdiv(B, 8)) * 8
    V128 = int(pl.cdiv(V, 128)) * 128
    TILE_N = min(1024, V128)                      # vocab tile: <=1024 lanes, mult of 128
    Vp = int(pl.cdiv(V128, TILE_N)) * TILE_N

    x_p = jnp.pad(state.astype(jnp.float32), ((0, Bp - B), (0, 0)))
    w2_p = jnp.pad(w2_t, ((0, 0), (0, Vp - V)))
    b2_p = jnp.pad(b2_r, ((0, 0), (0, Vp - V)))

    grid = (Vp // TILE_N,)
    out = pl.pallas_call(
        policy_net_kernel,
        out_shape=jax.ShapeDtypeStruct((Bp, Vp), jnp.float32),
        grid=grid,
        in_specs=[
            pl.BlockSpec((Bp, K), lambda j: (0, 0)),       # state: grid-invariant
            pl.BlockSpec((K, H), lambda j: (0, 0)),        # w1_t:  grid-invariant
            pl.BlockSpec((1, H), lambda j: (0, 0)),        # b1:    grid-invariant
            pl.BlockSpec((H, TILE_N), lambda j: (0, j)),   # w2_t:  vocab tile
            pl.BlockSpec((1, TILE_N), lambda j: (0, j)),   # b2:    vocab tile
        ],
        out_specs=pl.BlockSpec((Bp, TILE_N), lambda j: (0, j)),
        compiler_params=pltpu.CompilerParams(
            dimension_semantics=("parallel",),             # shard vocab tiles across TCs (v7x)
        ),
    )(x_p, w1_t, b1_r, w2_p, b2_p)

    return out[:B, :V]


def init_policy_net_params(key, vocab_size, state_dim, emb_dim=16, hidden=32):
    """Deterministic init mirroring the PyTorch module's parameter shapes."""
    k1, k2, k3, k4, k5 = jax.random.split(key, 5)
    # nn.Linear(state_dim, hidden): weight (hidden, state_dim), bias (hidden,)
    bound1 = 1.0 / jnp.sqrt(state_dim)
    w1 = jax.random.uniform(k1, (hidden, state_dim), jnp.float32, -bound1, bound1)
    b1 = jax.random.uniform(k2, (hidden,), jnp.float32, -bound1, bound1)
    # nn.Embedding(vocab_size, emb_dim): unused in forward, kept for shape fidelity
    emb = jax.random.normal(k3, (vocab_size, emb_dim), jnp.float32)
    # nn.Linear(hidden, vocab_size): weight (vocab_size, hidden), bias (vocab_size,)
    bound2 = 1.0 / jnp.sqrt(hidden)
    w2 = jax.random.uniform(k4, (vocab_size, hidden), jnp.float32, -bound2, bound2)
    b2 = jax.random.uniform(k5, (vocab_size,), jnp.float32, -bound2, bound2)
    return {"w1": w1, "b1": b1, "emb": emb, "w2": w2, "b2": b2}


def reference_forward(state, params):
    x = jnp.tanh(state @ params["w1"].T + params["b1"])
    return x @ params["w2"].T + params["b2"]


if __name__ == "__main__":
    vocab_size = 12
    state_dim = 2
    emb_dim = 16
    hidden = 32
    batch = 2

    key = jax.random.PRNGKey(0)
    kp, kx = jax.random.split(key)
    params = init_policy_net_params(kp, vocab_size, state_dim, emb_dim, hidden)

    # state: e.g. (thirst_flag, hunger_flag) style floats
    state = jax.random.uniform(kx, (batch, state_dim), jnp.float32)

    logits = policy_net_forward(
        state, params["w1"], params["b1"], params["w2"], params["b2"],
        weight_dtype=jnp.float32,  # set jnp.bfloat16 on v6e/v7x for real vocab sizes
    )
    logits = jax.block_until_ready(logits)

    ref = reference_forward(state, params)
    assert logits.shape == (batch, vocab_size)
    assert jnp.allclose(logits, ref, atol=1e-5, rtol=1e-5), "mismatch vs reference"

    print("KERNEL_OK")
</pallas_src>

<mosaic_0001>
module attributes {stable_mosaic.version = 11 : i64} {
  func.func @policy_net_kernel(%arg0: i32, %arg1: memref<8x2xf32, #tpu.memory_space<vmem>>, %arg2: memref<2x32xf32, #tpu.memory_space<vmem>>, %arg3: memref<1x32xf32, #tpu.memory_space<vmem>>, %arg4: memref<32x128xf32, #tpu.memory_space<vmem>>, %arg5: memref<1x128xf32, #tpu.memory_space<vmem>>, %arg6: memref<8x128xf32, #tpu.memory_space<vmem>>) attributes {dimension_semantics = [#tpu.dimension_semantics<parallel>], iteration_bounds = array<i64: 1>, scalar_prefetch = 0 : i64, scratch_operands = 0 : i64, tpu.core_type = #tpu.core_type<tc>, window_params = [{pipeline_mode = #tpu.pipeline_mode<synchronous>, transform_indices = @transform_0, window_bounds = array<i64: 8, 2>}, {pipeline_mode = #tpu.pipeline_mode<synchronous>, transform_indices = @transform_1, window_bounds = array<i64: 2, 32>}, {pipeline_mode = #tpu.pipeline_mode<synchronous>, transform_indices = @transform_2, window_bounds = array<i64: 1, 32>}, {transform_indices = @transform_3, window_bounds = array<i64: 32, 128>}, {transform_indices = @transform_4, window_bounds = array<i64: 1, 128>}, {transform_indices = @transform_5, window_bounds = array<i64: 8, 128>}]} {
    %c0 = arith.constant 0 : index
    %c0_0 = arith.constant 0 : index
    %0 = vector.load %arg1[%c0, %c0_0] : memref<8x2xf32, #tpu.memory_space<vmem>>, vector<8x2xf32>
    %c0_1 = arith.constant 0 : index
    %c0_2 = arith.constant 0 : index
    %1 = vector.load %arg2[%c0_1, %c0_2] : memref<2x32xf32, #tpu.memory_space<vmem>>, vector<2x32xf32>
    %c0_3 = arith.constant 0 : index
    %c0_4 = arith.constant 0 : index
    %2 = vector.load %arg3[%c0_3, %c0_4] : memref<1x32xf32, #tpu.memory_space<vmem>>, vector<1x32xf32>
    %3 = vector.extract_strided_slice %0 {offsets = [0, 0], sizes = [8, 1], strides = [1, 1]} : vector<8x2xf32> to vector<8x1xf32>
    %4 = vector.extract_strided_slice %1 {offsets = [0, 0], sizes = [1, 32], strides = [1, 1]} : vector<2x32xf32> to vector<1x32xf32>
    %5 = vector.broadcast %3 : vector<8x1xf32> to vector<8x32xf32>
    %6 = vector.broadcast %4 : vector<1x32xf32> to vector<8x32xf32>
    %7 = arith.mulf %5, %6 : vector<8x32xf32>
    %8 = vector.broadcast %2 : vector<1x32xf32> to vector<8x32xf32>
    %9 = arith.addf %8, %7 : vector<8x32xf32>
    %10 = vector.extract_strided_slice %0 {offsets = [0, 1], sizes = [8, 1], strides = [1, 1]} : vector<8x2xf32> to vector<8x1xf32>
    %11 = vector.extract_strided_slice %1 {offsets = [1, 0], sizes = [1, 32], strides = [1, 1]} : vector<2x32xf32> to vector<1x32xf32>
    %12 = vector.broadcast %10 : vector<8x1xf32> to vector<8x32xf32>
    %13 = vector.broadcast %11 : vector<1x32xf32> to vector<8x32xf32>
    %14 = arith.mulf %12, %13 : vector<8x32xf32>
    %15 = arith.addf %9, %14 : vector<8x32xf32>
    %16 = math.tanh %15 : vector<8x32xf32>
    %c0_5 = arith.constant 0 : index
    %c0_6 = arith.constant 0 : index
    %17 = vector.load %arg4[%c0_5, %c0_6] : memref<32x128xf32, #tpu.memory_space<vmem>>, vector<32x128xf32>
    %cst = arith.constant dense<0.000000e+00> : vector<8x128xf32>
    %18 = tpu.matmul %16, %17, %cst {dimension_numbers = #tpu.dot_dimension_numbers<[1], [0], [0], [1], [0, 0, 1, 1], [], []>} : vector<8x32xf32>, vector<32x128xf32>, vector<8x128xf32> -> vector<8x128xf32>
    %c0_7 = arith.constant 0 : index
    %c0_8 = arith.constant 0 : index
    %19 = vector.load %arg5[%c0_7, %c0_8] : memref<1x128xf32, #tpu.memory_space<vmem>>, vector<1x128xf32>
    %20 = vector.broadcast %19 : vector<1x128xf32> to vector<8x128xf32>
    %21 = arith.addf %18, %20 : vector<8x128xf32>
    %c0_9 = arith.constant 0 : index
    %c0_10 = arith.constant 0 : index
    %22 = vector.load %arg6[%c0_9, %c0_10] : memref<8x128xf32, #tpu.memory_space<vmem>>, vector<8x128xf32>
    tpu.vector_store %arg6[%c0_9, %c0_10], %21 {strides = array<i32>} : memref<8x128xf32, #tpu.memory_space<vmem>>, vector<8x128xf32>,
    return
  }
  func.func @transform_0(%arg0: i32) -> (i32, i32) {
    %c0_i32 = arith.constant 0 : i32
    %c0_i32_0 = arith.constant 0 : i32
    %c0_i32_1 = arith.constant 0 : i32
    return %c0_i32, %c0_i32_0 : i32, i32
  }
  func.func @transform_1(%arg0: i32) -> (i32, i32) {
    %c0_i32 = arith.constant 0 : i32
    %c0_i32_0 = arith.constant 0 : i32
    %c0_i32_1 = arith.constant 0 : i32
    return %c0_i32, %c0_i32_0 : i32, i32
  }
  func.func @transform_2(%arg0: i32) -> (i32, i32) {
    %c0_i32 = arith.constant 0 : i32
    %c0_i32_0 = arith.constant 0 : i32
    %c0_i32_1 = arith.constant 0 : i32
    return %c0_i32, %c0_i32_0 : i32, i32
  }
  func.func @transform_3(%arg0: i32) -> (i32, i32) {
    %c0_i32 = arith.constant 0 : i32
    %c0_i32_0 = arith.constant 0 : i32
    return %c0_i32, %arg0 : i32, i32
  }
  func.func @transform_4(%arg0: i32) -> (i32, i32) {
    %c0_i32 = arith.constant 0 : i32
    %c0_i32_0 = arith.constant 0 : i32
    return %c0_i32, %arg0 : i32, i32
  }
  func.func @transform_5(%arg0: i32) -> (i32, i32) {
    %c0_i32 = arith.constant 0 : i32
    %c0_i32_0 = arith.constant 0 : i32
    return %c0_i32, %arg0 : i32, i32
  }
}

</mosaic_0001>

<bundles_post_ra>
// kernel: tpu_custom_call.1
= control target key start
LH: loop header
LB: loop body
LE: loop exit
PB: predicated region body
PF: predicated region fallthrough
CT: control target
= control target key end

     0   :  { %10 = vsyncpa [#allocation3], 0  ;;  %s298_s0 = inlined_call_operand.vmem [shape: f32[8,2], index: 0, kind: input, shape index: {}]   ;;  %s299_s1 = inlined_call_operand.vmem [shape: f32[2,32], index: 1, kind: input, shape index: {}]   ;;  %s300_s2 = inlined_call_operand.vmem [shape: f32[1,32], index: 2, kind: input, shape index: {}]   ;;  %s301_s3 = inlined_call_operand.hbm [shape: f32[32,128], index: 3, kind: input, shape index: {}]   ;;  %s302_s4 = inlined_call_operand.vmem [shape: f32[1,128], index: 4, kind: input, shape index: {}]   ;;  %s303_s5 = inlined_call_operand.hbm [shape: f32[8,128], index: 5, kind: output, shape index: {}]  }
   0x1   :  { %11 = vsyncpa [#allocation4], 0  ;;  %s242_s18 = smov [#allocation2]  }
   0x2   :  { %s23_s19 = sshll.u32 %s242_s18, 4  ;;  %s24_s19 = int_to_ptr.vmem [resolvable:$true] %s23_s19 }
   0x3   :  { %s206_s20 = scalar_lea.vmem %s24_s19, 512  ;;  %p211_p1 = scmp.lt.s32.totalorder %s24_s19, %s24_s19 }
   0x4   :  { %p207_p0 = scmp.ne.s32.totalorder %s24_s19, %s206_s20  ;;  %p212_p2 = scmp.lt.s32.totalorder %s206_s20, %s206_s20 }
   0x6   :  { %p213_p3 = por %p212_p2, %p211_p1 }
   0x8   :  { %p214_p4 = pnand %p213_p3, %p207_p0 }
   0xa   :  { %217 = shalt.err (!%p214_p4)
}
   0xb   :  { %s243_s21 = smov 128   ;;  %s244_s22 = smov 8  }
   0xc   :  { %29 = dma.hbm_to_vmem [thread:$0]  %s301_s3, 512, %s24_s19, [#allocation3], %s243_s21, %s243_s21, %s244_s22  }
   0xd   :  { %238 = dma.done.wait [#allocation3], 512  }
   0xe   :  { %239 = vsyncadd [#allocation3], 4294966784  ;;  %v245_v0 = vmov 0   ;;  %v35_v1 = vld [vmem:[%s298_s0] sm:$0xff]  ;;  %v246_v2 = vmov 1   ;;  %v69_v3 = vld [vmem:[#allocation2 + $0x18] sm:$0xff]  ;;  %v43_v8 = vlaneseq }
   0xf   :  { %194 = vset.pattern.permute.xlu0 %v245_v0  ;;  %v247_v4 = vmov 0.0   ;;  %v68_v5 = vld [vmem:[#allocation2 + $0x10] sm:$0xff]  ;;  %vm248_vm0 = vmmov 0   ;;  %v67_v6 = vld [vmem:[#allocation2 + $0x8] sm:$0xff]  ;;  %v66_v7 = vld [vmem:[#allocation2] sm:$0xff]  ;;  %vm77_vm1 = vcmask 261120  }
  0x10   :  { %40 = vperm.xlu0 %194, %v35_v1   ;;  %175 = vmatprep.subr.mxu0 %v247_v4  ;;  %v44_v9 = vshrl.u32 %v43_v8, 7  ;;  %v36_v11 = vld [vmem:[%s299_s1] sm:$0x3]  ;;  %s249_s1 = smov [#allocation5]  }
  0x11   :  { %183 = vmatprep.mubr.msk.f32.mxu0 %vm248_vm0, %v247_v4  ;;  %176 = vmatpush3.msra.mxu0 %v69_v3  ;;  %v167_v17 = vld [vmem:[%s300_s2] ss:$0 sm:$0xff]  ;;  %s158_s6 = sshll.u32 %s249_s1, 4  ;;  %s159_s6 = int_to_ptr.vmem [resolvable:$true] %s158_s6 }
  0x12   :  { %177 = vmatprep.subr.mxu0 %v247_v4  ;;  %v45_v10 = vsub.s32 0, %v44_v9  ;;  %v61_v13 = vsub.s32 1, %v44_v9  ;;  %v168_v23 = vld [vmem:[%s302_s4] ss:$0 sm:$0xff]  ;;  %s218_s2 = scalar_lea.vmem %s159_s6, 128  ;;  %p223_p6 = scmp.lt.s32.totalorder %s159_s6, %s159_s6 }
  0x13   :  { %178 = vmatpush3.msra.mxu0 %v68_v5  ;;  %p219_p5 = scmp.ne.s32.totalorder %s159_s6, %s218_s2  ;;  %p224_p7 = scmp.lt.s32.totalorder %s218_s2, %s218_s2 }
  0x14   :  { %195 = vset.pattern.permute.xlu0 %v246_v2  ;;  %179 = vmatprep.subr.mxu0 %v247_v4  ;;  %v46_v12 = vrot.slane %v36_v11, %v45_v10  ;;  %v62_v16 = vrot.slane %v36_v11, %v61_v13 }
  0x15   :  { %56 = vperm.xlu0 %195, %v35_v1   ;;  %180 = vmatpush3.msra.mxu0 %v67_v6  ;;  %p225_p8 = por %p224_p7, %p223_p6 }
  0x16   :  { %181 = vmatprep.subr.mxu0 %v247_v4 }
  0x17   :  { %182 = vmatpush3.msra.mxu0 %v66_v7  ;;  %p226_p9 = pnand %p225_p8, %p219_p5 }
  0x8b   :  { %v41_v14 = vpop.permute.xlu0 %40 }
  0x8c   :  { %v47_v15 = vmul.f32 %v46_v12, %v41_v14 }
  0x8e   :  { %v54_v19 = vadd.f32 %v167_v17, %v47_v15 }
  0x90   :  { %v57_v18 = vpop.permute.xlu0 %56 }
  0x91   :  { %v63_v20 = vmul.f32 %v62_v16, %v57_v18 }
  0x93   :  { %v64_v21 = vadd.f32 %v63_v20, %v54_v19 }
  0x95   :  { %196 = vtanh.f32 %v64_v21 }
  0xa2   :  { %v197_v22 = vpop.eup %196 }
  0xa3   :  { %184 = vmatmul.mubr.msk.f32.vlgmr.msra.gmra.mxu0 %vm77_vm1, %v197_v22 }
 0x163   :  { %v147_v24 = vpop.f32.mrf.mxu0 }
 0x164   :  { %v148_v25 = vadd.f32 %v168_v23, %v147_v24 }
 0x165   :  { %v185_v26 = vpop.f32.mrf.mxu0 }
 0x166   :  { %151 = vst [vmem:[#allocation5] sm:$0xff] %v148_v25 }
 0x167   :  { %229 = shalt.err (!%p226_p9)
}
 0x168   :  { %161 = dma.vmem_to_hbm [thread:$0]  %s159_s6, 128, %s303_s5, [#allocation4]  }
 0x169   :  { %240 = dma.done.wait [#allocation4], 128  }
 0x16a   :  { %241 = vsyncadd [#allocation4], 4294967168 }
 0x16b   :  { %165 = vsyncpa [#allocation3], 1 }
 0x16c   :  { %166 = vsyncpa [#allocation4], 1 }

</bundles_post_ra>
